<compile_context>
chip_gen: v5e
topology: v5e:2x2
jax: 0.10.0
libtpu: 0.0.40
codegen_flags: <defaults>
</compile_context>

<pallas_src>
import functools

import jax
import jax.numpy as jnp
from jax.experimental import pallas as pl
from jax.experimental.pallas import tpu as pltpu

N_IN = 784
HIDDEN = 128
N_OUT = 10
N_OUT_PAD = 128  # lane-dense output width


def _mlp_kernel(x_ref, w1_ref, b1_ref, w2_ref, b2_ref, o_ref):
    # fc1: [TB,784]bf16 @ [784,128]bf16 -> f32 accum, +bias, ReLU (f32)
    h = jnp.dot(x_ref[...], w1_ref[...], preferred_element_type=jnp.float32)
    h = jnp.maximum(h + b1_ref[...], 0.0)
    # fc2: [TB,128]bf16 @ [128,128]bf16 (zero-padded cols 10..127) -> f32
    y = jnp.dot(h.astype(jnp.bfloat16), w2_ref[...],
                preferred_element_type=jnp.float32)
    o_ref[...] = (y + b2_ref[...]).astype(o_ref.dtype)


def _round_up(x, m):
    return pl.cdiv(x, m) * m


@functools.partial(jax.jit, static_argnames=("tile_b",))
def simple_model_forward(x, params, tile_b=256):
    """x: [B, 784] float32.  params: output of prepare_params()."""
    w1_t, b1_2d, w2_t, b2_2d = params
    B = x.shape[0]

    # Tile the batch; keep last-two-dims BlockSpec constraints satisfied
    # (tile divisible by 8/16 or equal to the full (padded) batch dim).
    tb = min(tile_b, _round_up(B, 8))
    b_pad = _round_up(B, tb)

    x_bf16 = x.astype(jnp.bfloat16)
    if b_pad != B:
        x_bf16 = jnp.pad(x_bf16, ((0, b_pad - B), (0, 0)))

    grid = (b_pad // tb,)

    bytes_accessed = (
        b_pad * N_IN * 2                     # x (bf16)
        + N_IN * HIDDEN * 2                  # w1 (bf16)
        + HIDDEN * N_OUT_PAD * 2             # w2 (bf16, padded)
        + (HIDDEN + N_OUT_PAD) * 4           # biases (f32)
        + b_pad * N_OUT_PAD * 4              # output (f32, padded)
    )

    out_padded = pl.pallas_call(
        _mlp_kernel,
        out_shape=jax.ShapeDtypeStruct((b_pad, N_OUT_PAD), jnp.float32),
        grid_spec=pltpu.PrefetchScalarGridSpec(
            num_scalar_prefetch=0,
            grid=grid,
            in_specs=[
                pl.BlockSpec((tb, N_IN), lambda i: (i, 0)),          # x tile
                pl.BlockSpec((N_IN, HIDDEN), lambda i: (0, 0)),      # w1 (resident)
                pl.BlockSpec((1, HIDDEN), lambda i: (0, 0)),         # b1 (resident)
                pl.BlockSpec((HIDDEN, N_OUT_PAD), lambda i: (0, 0)), # w2 (resident)
                pl.BlockSpec((1, N_OUT_PAD), lambda i: (0, 0)),      # b2 (resident)
            ],
            out_specs=pl.BlockSpec((tb, N_OUT_PAD), lambda i: (i, 0)),
        ),
        compiler_params=pltpu.CompilerParams(
            dimension_semantics=("parallel",),
        ),
        cost_estimate=pl.CostEstimate(
            flops=2 * b_pad * (N_IN * HIDDEN + HIDDEN * N_OUT_PAD),
            transcendentals=0,
            bytes_accessed=bytes_accessed,
        ),
    )(x_bf16, w1_t, b1_2d, w2_t, b2_2d)

    # Un-pad back to the module's true output shape.
    return out_padded[:B, :N_OUT]


def init_params(key):
    """Torch-layout params mimicking nn.Linear default init (U[-1/sqrt(fan_in), ..])."""
    k1, k2, k3, k4 = jax.random.split(key, 4)
    bound1 = 1.0 / jnp.sqrt(jnp.float32(N_IN))
    bound2 = 1.0 / jnp.sqrt(jnp.float32(HIDDEN))
    w1 = jax.random.uniform(k1, (HIDDEN, N_IN), jnp.float32, -bound1, bound1)
    b1 = jax.random.uniform(k2, (HIDDEN,), jnp.float32, -bound1, bound1)
    w2 = jax.random.uniform(k3, (N_OUT, HIDDEN), jnp.float32, -bound2, bound2)
    b2 = jax.random.uniform(k4, (N_OUT,), jnp.float32, -bound2, bound2)
    return w1, b1, w2, b2


def prepare_params(w1, b1, w2, b2, mask1=None, mask2=None):
    """One-time (out-of-hot-path) transform: fold sparsity masks, transpose to
    [in, out], zero-pad fc2's output dim to 128 lanes, cast weights to bf16."""
    if mask1 is not None:
        w1 = w1 * mask1
    if mask2 is not None:
        w2 = w2 * mask2
    w1_t = jnp.transpose(w1).astype(jnp.bfloat16)                    # [784, 128]
    w2_t = jnp.zeros((HIDDEN, N_OUT_PAD), jnp.float32)
    w2_t = w2_t.at[:, :N_OUT].set(jnp.transpose(w2)).astype(jnp.bfloat16)  # [128, 128]
    b1_2d = b1.reshape(1, HIDDEN).astype(jnp.float32)                # [1, 128]
    b2_2d = jnp.zeros((1, N_OUT_PAD), jnp.float32).at[0, :N_OUT].set(b2)   # [1, 128]
    return w1_t, b1_2d, w2_t, b2_2d


if __name__ == "__main__":
    key = jax.random.PRNGKey(0)
    kx, kp = jax.random.split(key)

    B = 8
    x = jax.random.normal(kx, (B, N_IN), jnp.float32)
    w1, b1, w2, b2 = init_params(kp)

    # Sparsity masks (all ones: scheduler has not pruned anything yet).
    mask1 = jnp.ones_like(w1)
    mask2 = jnp.ones_like(w2)
    params = prepare_params(w1, b1, w2, b2, mask1, mask2)

    out = simple_model_forward(x, params)
    out = jax.block_until_ready(out)

    # Reference in full f32 (torch semantics); kernel uses bf16 inputs with
    # f32 accumulation, so use a tolerance consistent with bf16 rounding.
    ref = jnp.maximum(x @ w1.T + b1, 0.0) @ w2.T + b2
    assert out.shape == (B, N_OUT)
    assert jnp.allclose(out, ref, atol=2e-2, rtol=2e-2), (
        float(jnp.max(jnp.abs(out - ref))))

    print("KERNEL_OK")
</pallas_src>

<mosaic_0001>
module attributes {stable_mosaic.version = 11 : i64} {
  func.func @_mlp_kernel(%arg0: i32, %arg1: memref<8x784xbf16, #tpu.memory_space<vmem>>, %arg2: memref<784x128xbf16, #tpu.memory_space<vmem>>, %arg3: memref<1x128xf32, #tpu.memory_space<vmem>>, %arg4: memref<128x128xbf16, #tpu.memory_space<vmem>>, %arg5: memref<1x128xf32, #tpu.memory_space<vmem>>, %arg6: memref<8x128xf32, #tpu.memory_space<vmem>>) attributes {dimension_semantics = [#tpu.dimension_semantics<parallel>], iteration_bounds = array<i64: 1>, scalar_prefetch = 0 : i64, scratch_operands = 0 : i64, tpu.core_type = #tpu.core_type<tc>, window_params = [{transform_indices = @transform_0, window_bounds = array<i64: 8, 784>}, {pipeline_mode = #tpu.pipeline_mode<synchronous>, transform_indices = @transform_1, window_bounds = array<i64: 784, 128>}, {pipeline_mode = #tpu.pipeline_mode<synchronous>, transform_indices = @transform_2, window_bounds = array<i64: 1, 128>}, {pipeline_mode = #tpu.pipeline_mode<synchronous>, transform_indices = @transform_3, window_bounds = array<i64: 128, 128>}, {pipeline_mode = #tpu.pipeline_mode<synchronous>, transform_indices = @transform_4, window_bounds = array<i64: 1, 128>}, {transform_indices = @transform_5, window_bounds = array<i64: 8, 128>}]} {
    %c0 = arith.constant 0 : index
    %c0_0 = arith.constant 0 : index
    %0 = vector.load %arg1[%c0, %c0_0] : memref<8x784xbf16, #tpu.memory_space<vmem>>, vector<8x784xbf16>
    %c0_1 = arith.constant 0 : index
    %c0_2 = arith.constant 0 : index
    %1 = vector.load %arg2[%c0_1, %c0_2] : memref<784x128xbf16, #tpu.memory_space<vmem>>, vector<784x128xbf16>
    %cst = arith.constant dense<0.000000e+00> : vector<8x128xf32>
    %2 = tpu.matmul %0, %1, %cst {dimension_numbers = #tpu.dot_dimension_numbers<[1], [0], [0], [1], [0, 0, 1, 1], [], []>} : vector<8x784xbf16>, vector<784x128xbf16>, vector<8x128xf32> -> vector<8x128xf32>
    %c0_3 = arith.constant 0 : index
    %c0_4 = arith.constant 0 : index
    %3 = vector.load %arg3[%c0_3, %c0_4] : memref<1x128xf32, #tpu.memory_space<vmem>>, vector<1x128xf32>
    %4 = vector.broadcast %3 : vector<1x128xf32> to vector<8x128xf32>
    %5 = arith.addf %2, %4 : vector<8x128xf32>
    %cst_5 = arith.constant 0.000000e+00 : f32
    %6 = vector.broadcast %cst_5 : f32 to vector<8x128xf32>
    %7 = arith.maximumf %5, %6 : vector<8x128xf32>
    %8 = arith.truncf %7 : vector<8x128xf32> to vector<8x128xbf16>
    %c0_6 = arith.constant 0 : index
    %c0_7 = arith.constant 0 : index
    %9 = vector.load %arg4[%c0_6, %c0_7] : memref<128x128xbf16, #tpu.memory_space<vmem>>, vector<128x128xbf16>
    %cst_8 = arith.constant dense<0.000000e+00> : vector<8x128xf32>
    %10 = tpu.matmul %8, %9, %cst_8 {dimension_numbers = #tpu.dot_dimension_numbers<[1], [0], [0], [1], [0, 0, 1, 1], [], []>} : vector<8x128xbf16>, vector<128x128xbf16>, vector<8x128xf32> -> vector<8x128xf32>
    %c0_9 = arith.constant 0 : index
    %c0_10 = arith.constant 0 : index
    %11 = vector.load %arg5[%c0_9, %c0_10] : memref<1x128xf32, #tpu.memory_space<vmem>>, vector<1x128xf32>
    %12 = vector.broadcast %11 : vector<1x128xf32> to vector<8x128xf32>
    %13 = arith.addf %10, %12 : vector<8x128xf32>
    %c0_11 = arith.constant 0 : index
    %c0_12 = arith.constant 0 : index
    %14 = vector.load %arg6[%c0_11, %c0_12] : memref<8x128xf32, #tpu.memory_space<vmem>>, vector<8x128xf32>
    tpu.vector_store %arg6[%c0_11, %c0_12], %13 {strides = array<i32>} : memref<8x128xf32, #tpu.memory_space<vmem>>, vector<8x128xf32>,
    return
  }
  func.func @transform_0(%arg0: i32) -> (i32, i32) {
    %c0_i32 = arith.constant 0 : i32
    %c0_i32_0 = arith.constant 0 : i32
    return %arg0, %c0_i32 : i32, i32
  }
  func.func @transform_1(%arg0: i32) -> (i32, i32) {
    %c0_i32 = arith.constant 0 : i32
    %c0_i32_0 = arith.constant 0 : i32
    %c0_i32_1 = arith.constant 0 : i32
    return %c0_i32, %c0_i32_0 : i32, i32
  }
  func.func @transform_2(%arg0: i32) -> (i32, i32) {
    %c0_i32 = arith.constant 0 : i32
    %c0_i32_0 = arith.constant 0 : i32
    %c0_i32_1 = arith.constant 0 : i32
    return %c0_i32, %c0_i32_0 : i32, i32
  }
  func.func @transform_3(%arg0: i32) -> (i32, i32) {
    %c0_i32 = arith.constant 0 : i32
    %c0_i32_0 = arith.constant 0 : i32
    %c0_i32_1 = arith.constant 0 : i32
    return %c0_i32, %c0_i32_0 : i32, i32
  }
  func.func @transform_4(%arg0: i32) -> (i32, i32) {
    %c0_i32 = arith.constant 0 : i32
    %c0_i32_0 = arith.constant 0 : i32
    %c0_i32_1 = arith.constant 0 : i32
    return %c0_i32, %c0_i32_0 : i32, i32
  }
  func.func @transform_5(%arg0: i32) -> (i32, i32) {
    %c0_i32 = arith.constant 0 : i32
    %c0_i32_0 = arith.constant 0 : i32
    return %arg0, %c0_i32 : i32, i32
  }
}

</mosaic_0001>

<bundles_post_ra>
// kernel: simple_model_forward.1
= control target key start
LH: loop header
LB: loop body
LE: loop exit
PB: predicated region body
PF: predicated region fallthrough
CT: control target
= control target key end

     0   :  { %10 = vsyncpa [#allocation3], 0  ;;  %s1084_s0 = inlined_call_operand.vmem [shape: bf16[8,784], index: 0, kind: input, shape index: {}]   ;;  %s1085_s1 = inlined_call_operand.hbm [shape: bf16[784,128], index: 1, kind: input, shape index: {}]   ;;  %s1086_s2 = inlined_call_operand.vmem [shape: f32[1,128], index: 2, kind: input, shape index: {}]   ;;  %s1087_s3 = inlined_call_operand.vmem [shape: bf16[128,128], index: 3, kind: input, shape index: {}]   ;;  %s1088_s4 = inlined_call_operand.vmem [shape: f32[1,128], index: 4, kind: input, shape index: {}]   ;;  %s1089_s5 = inlined_call_operand.hbm [shape: f32[8,128], index: 5, kind: output, shape index: {}]  }
   0x1   :  { %11 = vsyncpa [#allocation4], 0  ;;  %s18_s20 = sshll.u32 %s1085_s1, 4  ;;  %s1002_s21 = smov [#allocation2]   ;;  %s19_s20 = int_to_ptr.hbm [resolvable:$true] %s18_s20 }
   0x2   :  { %s20_s22 = sshll.u32 %s1002_s21, 4  ;;  %s1003_s23 = smov 64   ;;  %s21_s22 = int_to_ptr.vmem [resolvable:$true] %s20_s22 }
   0x3   :  { %s1004_s24 = smov 4  }
   0x4   :  { %26 = dma.hbm_to_vmem [thread:$0]  %s19_s20, 6272, %s21_s22, [#allocation3], %s1003_s23, %s1003_s23, %s1004_s24  }
   0x5   :  { %998 = dma.done.wait [#allocation3], 6272  }
   0x6   :  { %999 = vsyncadd [#allocation3], 4294961024  ;;  %v894_v0 = vld [vmem:[#allocation2 + $0x38] sm:$0xff]  ;;  %v893_v3 = vld [vmem:[#allocation2 + $0x30] sm:$0xff]  ;;  %vm462_vm0 = vcmask 130048   ;;  %s1005_s24 = smov [#allocation5]  }
   0x7   :  { %v902_v1 = vld [vmem:[#allocation2 + $0x78] sm:$0xff]  ;;  %466 = vmatpush.bf16.msra.mxu0 %v894_v0  ;;  %v901_v4 = vld [vmem:[#allocation2 + $0x70] sm:$0xff]  ;;  %v892_v8 = vld [vmem:[#allocation2 + $0x28] sm:$0xff]  ;;  %s646_s1 = sshll.u32 %s1005_s24, 4  ;;  %s648_s27 = sshll.u32 %s1089_s5, 4  ;;  %s647_s1 = int_to_ptr.vmem [resolvable:$true] %s646_s1  ;;  %s649_s27 = int_to_ptr.hbm [resolvable:$true] %s648_s27 }
   0x8   :  { %v910_v2 = vld [vmem:[#allocation2 + $0xb8] sm:$0xff]  ;;  %479 = vmatpush.bf16.msra.mxu1 %v902_v1  ;;  %v909_v5 = vld [vmem:[#allocation2 + $0xb0] sm:$0xff]  ;;  %v900_v9 = vld [vmem:[#allocation2 + $0x68] sm:$0xff] }
   0x9   :  { %492 = vmatpush.bf16.msra.mxu2 %v910_v2  ;;  %v918_v6 = vld [vmem:[#allocation2 + $0xf8] sm:$0xff]  ;;  %v917_v7 = vld [vmem:[#allocation2 + $0xf0] sm:$0xff]  ;;  %v908_v10 = vld [vmem:[#allocation2 + $0xa8] sm:$0xff] }
   0xa   :  { %505 = vmatpush.bf16.msra.mxu3 %v918_v6  ;;  %v916_v11 = vld [vmem:[#allocation2 + $0xe8] sm:$0xff]  ;;  %v891_v12 = vld [vmem:[#allocation2 + $0x20] sm:$0xff]  ;;  %v890_v16 = vld [vmem:[#allocation2 + $0x18] sm:$0xff] }
   0xb   :  { %467 = vmatpush.bf16.msra.mxu0 %v893_v3  ;;  %v899_v13 = vld [vmem:[#allocation2 + $0x60] sm:$0xff]  ;;  %v898_v17 = vld [vmem:[#allocation2 + $0x58] sm:$0xff]  ;;  %v889_v20 = vld [vmem:[#allocation2 + $0x10] sm:$0xff] }
   0xc   :  { %480 = vmatpush.bf16.msra.mxu1 %v901_v4  ;;  %v907_v14 = vld [vmem:[#allocation2 + $0xa0] sm:$0xff]  ;;  %v906_v18 = vld [vmem:[#allocation2 + $0x98] sm:$0xff]  ;;  %v897_v21 = vld [vmem:[#allocation2 + $0x50] sm:$0xff] }
   0xd   :  { %493 = vmatpush.bf16.msra.mxu2 %v909_v5  ;;  %v915_v15 = vld [vmem:[#allocation2 + $0xe0] sm:$0xff]  ;;  %v914_v19 = vld [vmem:[#allocation2 + $0xd8] sm:$0xff]  ;;  %v905_v22 = vld [vmem:[#allocation2 + $0x90] sm:$0xff] }
   0xe   :  { %506 = vmatpush.bf16.msra.mxu3 %v917_v7  ;;  %v913_v23 = vld [vmem:[#allocation2 + $0xd0] sm:$0xff]  ;;  %v888_v24 = vld [vmem:[#allocation2 + $0x8] sm:$0xff]  ;;  %v38_v26 = vld [vmem:[%s1084_s0] sm:$0xff] }
   0xf   :  { %468 = vmatpush.bf16.msra.mxu0 %v892_v8  ;;  %v896_v25 = vld [vmem:[#allocation2 + $0x48] sm:$0xff]  ;;  %v148_v29 = vunpack.c.l.b16 %v38_v26  ;;  %v149_v31 = vunpack.c.h.b16 %v38_v26  ;;  %v887_v32 = vld [vmem:[#allocation2] sm:$0xff]  ;;  %v926_v34 = vld [vmem:[#allocation2 + $0x138] sm:$0xff] }
  0x10   :  { %481 = vmatpush.bf16.msra.mxu1 %v900_v9  ;;  %v904_v27 = vld [vmem:[#allocation2 + $0x88] sm:$0xff]  ;;  %v895_v33 = vld [vmem:[#allocation2 + $0x40] sm:$0xff]  ;;  %v934_v35 = vld [vmem:[#allocation2 + $0x178] sm:$0xff] }
  0x11   :  { %494 = vmatpush.bf16.msra.mxu2 %v908_v10  ;;  %v39_v28 = vld [vmem:[%s1084_s0 + $0x8] sm:$0xff]  ;;  %v903_v36 = vld [vmem:[#allocation2 + $0x80] sm:$0xff]  ;;  %v155_v38 = vpack.c.b16 %v148_v29, %v148_v29  ;;  %v156_v39 = vpack.c.b16 %v149_v31, %v149_v31  ;;  %v925_v43 = vld [vmem:[#allocation2 + $0x130] sm:$0xff] }
  0x12   :  { %507 = vmatpush.bf16.msra.mxu3 %v916_v11  ;;  %v912_v30 = vld [vmem:[#allocation2 + $0xc8] sm:$0xff]  ;;  %v150_v37 = vunpack.c.l.b16 %v39_v28  ;;  %v151_v40 = vunpack.c.h.b16 %v39_v28  ;;  %v911_v41 = vld [vmem:[#allocation2 + $0xc0] sm:$0xff]  ;;  %v933_v44 = vld [vmem:[#allocation2 + $0x170] sm:$0xff] }
  0x13   :  { %469 = vmatpush.bf16.msra.mxu0 %v891_v12  ;;  %v935_v42 = vld [vmem:[#allocation2 + $0x180] sm:$0xff]  ;;  %v924_v47 = vld [vmem:[#allocation2 + $0x128] sm:$0xff]  ;;  %v41_v51 = vld [vmem:[%s1084_s0 + $0x18] sm:$0xf] }
  0x14   :  { %482 = vmatpush.bf16.msra.mxu1 %v899_v13  ;;  %v157_v45 = vpack.c.b16 %v150_v37, %v150_v37  ;;  %v158_v46 = vpack.c.b16 %v151_v40, %v151_v40  ;;  %v932_v48 = vld [vmem:[#allocation2 + $0x168] sm:$0xff]  ;;  %v923_v49 = vld [vmem:[#allocation2 + $0x120] sm:$0xff]  ;;  %v922_v52 = vld [vmem:[#allocation2 + $0x118] sm:$0xff]  ;;  %v154_v54 = vunpack.c.l.b16 %v41_v51 }
  0x15   :  { %495 = vmatpush.bf16.msra.mxu2 %v907_v14  ;;  %v931_v50 = vld [vmem:[#allocation2 + $0x160] sm:$0xff]  ;;  %v930_v53 = vld [vmem:[#allocation2 + $0x158] sm:$0xff]  ;;  %v921_v55 = vld [vmem:[#allocation2 + $0x110] sm:$0xff] }
  0x16   :  { %508 = vmatpush.bf16.msra.mxu3 %v915_v15  ;;  %v929_v56 = vld [vmem:[#allocation2 + $0x150] sm:$0xff]  ;;  %v161_v57 = vpack.c.b16 %v154_v54, %v154_v54  ;;  %v920_v58 = vld [vmem:[#allocation2 + $0x108] sm:$0xff]  ;;  %v919_v63 = vld [vmem:[#allocation2 + $0x100] sm:$0xff] }
  0x17   :  { %470 = vmatpush.bf16.msra.mxu0 %v890_v16  ;;  %v928_v59 = vld [vmem:[#allocation2 + $0x148] sm:$0xff]  ;;  %v40_v60 = vld [vmem:[%s1084_s0 + $0x10] sm:$0xff]  ;;  %v927_v0 = vld [vmem:[#allocation2 + $0x140] sm:$0xff] }
  0x18   :  { %483 = vmatpush.bf16.msra.mxu1 %v898_v17  ;;  %v152_v61 = vunpack.c.l.b16 %v40_v60  ;;  %v153_v62 = vunpack.c.h.b16 %v40_v60  ;;  %v943_v3 = vld [vmem:[%s1087_s3 + $0x38] sm:$0xff]  ;;  %v942_v4 = vld [vmem:[%s1087_s3 + $0x30] sm:$0xff]  ;;  %v941_v5 = vld [vmem:[%s1087_s3 + $0x28] sm:$0xff] }
  0x19   :  { %496 = vmatpush.bf16.msra.mxu2 %v906_v18  ;;  %v940_v6 = vld [vmem:[%s1087_s3 + $0x20] sm:$0xff]  ;;  %v939_v7 = vld [vmem:[%s1087_s3 + $0x18] sm:$0xff]  ;;  %v938_v8 = vld [vmem:[%s1087_s3 + $0x10] sm:$0xff] }
  0x1a   :  { %509 = vmatpush.bf16.msra.mxu3 %v914_v19  ;;  %v159_v1 = vpack.c.b16 %v152_v61, %v152_v61  ;;  %v160_v2 = vpack.c.b16 %v153_v62, %v153_v62  ;;  %v937_v9 = vld [vmem:[%s1087_s3 + $0x8] sm:$0xff]  ;;  %v936_v12 = vld [vmem:[%s1087_s3] sm:$0xff] }
  0x1b   :  { %471 = vmatpush.bf16.msra.mxu0 %v889_v20  ;;  %v948_v17 = vld [vmem:[%s1086_s2] ss:$0 sm:$0xff] }
  0x1c   :  { %484 = vmatpush.bf16.msra.mxu1 %v897_v21 }
  0x1d   :  { %497 = vmatpush.bf16.msra.mxu2 %v905_v22 }
  0x1e   :  { %510 = vmatpush.bf16.msra.mxu3 %v913_v23 }
  0x1f   :  { %472 = vmatpush.bf16.msra.mxu0 %v888_v24 }
  0x20   :  { %485 = vmatpush.bf16.msra.mxu1 %v896_v25 }
  0x21   :  { %498 = vmatpush.bf16.msra.mxu2 %v904_v27 }
  0x22   :  { %511 = vmatpush.bf16.msra.mxu3 %v912_v30 }
  0x23   :  { %473 = vmatpush.bf16.msra.mxu0 %v887_v32 }
  0x24   :  { %486 = vmatpush.bf16.msra.mxu1 %v895_v33 }
  0x25   :  { %499 = vmatpush.bf16.msra.mxu2 %v903_v36 }
  0x26   :  { %474 = vmatmul.bf16.vlgmr.msra.gmra.mxu0 %v155_v38  ;;  %512 = vmatpush.bf16.msra.mxu3 %v911_v41 }
  0x27   :  { %518 = vmatpush.bf16.msrb.mxu0 %v926_v34  ;;  %487 = vmatmul.bf16.vlgmr.msra.gmra.mxu1 %v156_v39 }
  0x28   :  { %531 = vmatpush.bf16.msrb.mxu1 %v934_v35  ;;  %500 = vmatmul.bf16.vlgmr.msra.gmra.mxu2 %v157_v45  ;;  %v949_v35 = vld [vmem:[%s1088_s4] ss:$0 sm:$0xff] }
  0x29   :  { %551 = vmatpush.bf16.msrb.mxu2 %v935_v42  ;;  %513 = vmatmul.bf16.vlgmr.msra.gmra.mxu3 %v158_v46 }
  0x2a   :  { %627 = vmatpush.bf16.msrb.mxu3 %v943_v3 }
  0x2b   :  { %519 = vmatpush.bf16.msrb.mxu0 %v925_v43 }
  0x2c   :  { %532 = vmatpush.bf16.msrb.mxu1 %v933_v44 }
  0x2e   :  { %628 = vmatpush.bf16.msrb.mxu3 %v942_v4 }
  0x2f   :  { %520 = vmatpush.bf16.msrb.mxu0 %v924_v47 }
  0x30   :  { %533 = vmatpush.bf16.msrb.mxu1 %v932_v48 }
  0x32   :  { %629 = vmatpush.bf16.msrb.mxu3 %v941_v5 }
  0x33   :  { %521 = vmatpush.bf16.msrb.mxu0 %v923_v49 }
  0x34   :  { %534 = vmatpush.bf16.msrb.mxu1 %v931_v50 }
  0x36   :  { %630 = vmatpush.bf16.msrb.mxu3 %v940_v6 }
  0x37   :  { %522 = vmatpush.bf16.msrb.mxu0 %v922_v52 }
  0x38   :  { %535 = vmatpush.bf16.msrb.mxu1 %v930_v53  ;;  %854 = vmatmul.msk.bf16.vlgmr.msrb.gmra.mxu2 %vm462_vm0, %v161_v57 }
  0x3a   :  { %631 = vmatpush.bf16.msrb.mxu3 %v939_v7 }
  0x3b   :  { %523 = vmatpush.bf16.msrb.mxu0 %v921_v55 }
  0x3c   :  { %536 = vmatpush.bf16.msrb.mxu1 %v929_v56 }
  0x3e   :  { %632 = vmatpush.bf16.msrb.mxu3 %v938_v8 }
  0x3f   :  { %524 = vmatpush.bf16.msrb.mxu0 %v920_v58 }
  0x40   :  { %537 = vmatpush.bf16.msrb.mxu1 %v928_v59 }
  0x42   :  { %633 = vmatpush.bf16.msrb.mxu3 %v937_v9 }
  0x43   :  { %525 = vmatpush.bf16.msrb.mxu0 %v919_v63 }
  0x44   :  { %538 = vmatpush.bf16.msrb.mxu1 %v927_v0 }
  0x46   :  { %526 = vmatmul.bf16.vlgmr.msrb.gmra.mxu0 %v159_v1  ;;  %634 = vmatpush.bf16.msrb.mxu3 %v936_v12 }
  0x47   :  { %539 = vmatmul.bf16.vlgmr.msrb.gmra.mxu1 %v160_v2 }
  0xa3   :  { %v475_v10 = vpop.f32.mrf.mxu0 }
  0xa4   :  { %v488_v11 = vpop.f32.mrf.mxu1  ;;  %v476_v18 = vadd.f32 %v948_v17, %v475_v10 }
  0xa6   :  { %v489_v21 = vadd.f32 %v488_v11, %v476_v18 }
  0xab   :  { %v477_v13 = vpop.f32.mrf.mxu0  ;;  %v501_v15 = vpop.f32.mrf.mxu2 }
  0xac   :  { %v490_v14 = vpop.f32.mrf.mxu1  ;;  %v514_v16 = vpop.f32.mrf.mxu3  ;;  %v502_v22 = vadd.f32 %v501_v15, %v489_v21 }
  0xae   :  { %v515_v24 = vadd.f32 %v514_v16, %v502_v22 }
  0xb3   :  { %v503_v19 = vpop.f32.mrf.mxu2 }
  0xb4   :  { %v516_v20 = vpop.f32.mrf.mxu3 }
  0xbb   :  { %v553_v23 = vpop.f32.mrf.mxu2 }
  0xc3   :  { %v527_v25 = vpop.f32.mrf.mxu0  ;;  %v555_v29 = vpop.f32.mrf.mxu2 }
  0xc4   :  { %v540_v26 = vpop.f32.mrf.mxu1  ;;  %v528_v27 = vadd.f32 %v527_v25, %v515_v24 }
  0xc6   :  { %v541_v28 = vadd.f32 %v540_v26, %v528_v27 }
  0xc8   :  { %v554_v30 = vadd.f32 %v553_v23, %v541_v28 }
  0xca   :  { %v557_v31 = vmax.f32 %v554_v30, 0.0 }
  0xcb   :  { %v529_v32 = vpop.f32.mrf.mxu0 }
  0xcc   :  { %v542_v33 = vpop.f32.mrf.mxu1  ;;  %v558_v34 = vpack.c.bf16 %v557_v31, %v557_v31 }
  0xce   :  { %635 = vmatmul.bf16.vlgmr.msrb.gmra.mxu3 %v558_v34 }
 0x151   :  { %v636_v36 = vpop.f32.mrf.mxu3 }
 0x152   :  { %v637_v37 = vadd.f32 %v949_v35, %v636_v36 }
 0x154   :  { %640 = vst [vmem:[#allocation5] sm:$0xff] %v637_v37 }
 0x155   :  { %651 = dma.vmem_to_hbm [thread:$0]  %s647_s1, 128, %s649_s27, [#allocation4]  }
 0x159   :  { %v638_v38 = vpop.f32.mrf.mxu3 }
 0x15a   :  { %1000 = dma.done.wait [#allocation4], 128  }
 0x15b   :  { %1001 = vsyncadd [#allocation4], 4294967168 }
 0x15c   :  { %656 = vsyncpa [#allocation3], 1 }
 0x15d   :  { %657 = vsyncpa [#allocation4], 1 }

</bundles_post_ra>
